<compile_context>
chip_gen: v7x
topology: tpu7x:2x2x1
jax: 0.10.0
libtpu: 0.0.40
codegen_flags: <defaults>
</compile_context>

<pallas_src>
import functools

import jax
import jax.numpy as jnp
from jax.experimental import pallas as pl
from jax.experimental.pallas import tpu as pltpu

_LANE = 128      # lane width  (last-dim alignment)
_SUBLANE = 8     # f32 sublane count (second-to-last-dim alignment)


def _round_up(x, m):
    return ((x + m - 1) // m) * m


def _vmem_capacity_bytes():
    """Per-TensorCore VMEM (v5e/v6e: 128 MiB, v7x: 64 MiB). Conservative fallback."""
    try:
        info = pltpu.get_tpu_info()
        cap = getattr(info, "vmem_capacity_bytes", None)
        if cap:
            return int(cap)
    except Exception:
        pass
    return 64 * 1024 * 1024


def _fused_mlp_kernel(*refs, n_layers: int):
    """refs = (x_ref, w1, b1, ..., wn, bn, o_ref).

    Weights are pre-transposed/padded: w_i is (Din_i, Dout_i_pad) in bf16.
    Matmuls run on the MXU in bf16 with f32 accumulation; bias-add + ReLU are
    an f32 epilogue. Intermediate activations never leave VMEM.
    """
    x_ref = refs[0]
    o_ref = refs[-1]
    wb = refs[1:-1]
    compute_dtype = x_ref.dtype

    h = x_ref[...]
    for i in range(n_layers):
        w_ref = wb[2 * i]
        b_ref = wb[2 * i + 1]
        acc = jnp.dot(h, w_ref[...], preferred_element_type=jnp.float32)
        acc = acc + b_ref[...]                         # f32 bias broadcast
        if i != n_layers - 1:
            h = jnp.maximum(acc, 0.0).astype(compute_dtype)   # ReLU, back to bf16
        else:
            h = acc
    o_ref[...] = h.astype(o_ref.dtype)


def prepare_params(params, compute_dtype=jnp.bfloat16):
    """One-time prep (hoisted out of the forward path).

    torch-style (out, in) weights -> transposed, output dim zero-padded to 128
    lanes, cast to `compute_dtype`.  The first layer keeps its exact input
    width (so x needs no wrapper-side feature pad); later layers take the
    previous layer's padded width.  Zero padding is exact: padded weight
    rows/cols and bias entries are 0 and ReLU(0)=0.
    Returns list of (wT[bf16], b2d[f32], dout).
    """
    prepped = []
    prev_out_p = None
    for idx, (w, b) in enumerate(params):
        w = jnp.asarray(w, jnp.float32)
        dout, din = w.shape
        din_p = din if idx == 0 else prev_out_p
        assert din <= din_p, "layer input width exceeds previous padded width"
        dout_p = _round_up(dout, _LANE)
        wt = jnp.zeros((din_p, dout_p), jnp.float32).at[:din, :dout].set(w.T)
        wt = wt.astype(compute_dtype)
        bp = jnp.zeros((1, dout_p), jnp.float32)
        if b is not None:
            bp = bp.at[0, :dout].set(jnp.asarray(b, jnp.float32))
        prepped.append((wt, bp, dout))
        prev_out_p = dout_p
    return prepped


def _select_batch_tile(B, prepped, x_itemsize, out_itemsize, vmem_cap, batch_tile):
    din = prepped[0][0].shape[0]
    dout_p = prepped[-1][0].shape[1]
    max_dim = max([din] + [wt.shape[1] for wt, _, _ in prepped])

    # Resident bytes: single-buffered weights + biases.
    w_bytes = sum(wt.size * wt.dtype.itemsize + bp.size * bp.dtype.itemsize
                  for wt, bp, _ in prepped)
    budget = int(0.75 * vmem_cap) - w_bytes
    # Per-batch-row VMEM: double-buffered x/out tiles + live f32/bf16 activations.
    per_row = 2 * (din * x_itemsize + dout_p * out_itemsize) + 6 * max_dim
    # Keep the live f32 activation in the low-MiB range (avoid vreg/VMEM spills).
    act_cap = max(_SUBLANE, (4 * 1024 * 1024) // max(1, 4 * max_dim))

    tb_cap = batch_tile if batch_tile is not None else 1024
    tb = max(_SUBLANE, min(tb_cap, budget // max(1, per_row), act_cap))
    tb = max(_SUBLANE, (tb // _SUBLANE) * _SUBLANE)
    tb = min(tb, _round_up(B, _SUBLANE))
    # Give both v7x TensorCores work: aim for >= 2 grid steps when possible.
    if pl.cdiv(B, tb) < 2 and tb > _SUBLANE:
        tb = max(_SUBLANE, _round_up(pl.cdiv(B, 2), _SUBLANE))
    return tb


def fixed_para_mlp_forward(x, prepped, *, batch_tile=None, out_dtype=jnp.float32):
    """Fused MLP forward.  `prepped` comes from prepare_params()."""
    B, din = x.shape
    n_layers = len(prepped)
    assert din == prepped[0][0].shape[0]
    dout_p = prepped[-1][0].shape[1]
    dout = prepped[-1][2]
    compute_dtype = prepped[0][0].dtype

    vmem_cap = _vmem_capacity_bytes()
    x_c = x.astype(compute_dtype)
    tb = _select_batch_tile(B, prepped, x_c.dtype.itemsize,
                            jnp.dtype(out_dtype).itemsize, vmem_cap, batch_tile)
    grid = (pl.cdiv(B, tb),)          # ragged last tile masked by Pallas (no wrapper pad)

    in_specs = [pl.BlockSpec((tb, din), lambda i: (i, 0))]
    flat_args = [x_c]
    flops = 0
    bytes_accessed = x_c.size * x_c.dtype.itemsize + B * dout_p * jnp.dtype(out_dtype).itemsize
    for wt, bp, _ in prepped:
        # Constant block index -> VMEM-resident; single buffer (no double-buffer waste).
        in_specs.append(pl.BlockSpec(wt.shape, lambda i: (0, 0),
                                     pipeline_mode=pl.Buffered(1)))
        in_specs.append(pl.BlockSpec(bp.shape, lambda i: (0, 0),
                                     pipeline_mode=pl.Buffered(1)))
        flat_args.append(wt)
        flat_args.append(bp)
        flops += 2 * B * wt.shape[0] * wt.shape[1]
        bytes_accessed += wt.size * wt.dtype.itemsize + bp.size * bp.dtype.itemsize

    out_specs = pl.BlockSpec((tb, dout_p), lambda i: (i, 0))

    # Generation-aware VMEM limit: ~108 MiB on v5e/v6e (128 MiB), ~54 MiB on v7x (64 MiB).
    vmem_limit = int(min(int(0.85 * vmem_cap), vmem_cap - (8 << 20)))

    out = pl.pallas_call(
        functools.partial(_fused_mlp_kernel, n_layers=n_layers),
        out_shape=jax.ShapeDtypeStruct((B, dout_p), out_dtype),
        grid=grid,
        in_specs=in_specs,
        out_specs=out_specs,
        compiler_params=pltpu.CompilerParams(
            dimension_semantics=("parallel",),
            vmem_limit_bytes=vmem_limit,
        ),
        cost_estimate=pl.CostEstimate(
            flops=flops, transcendentals=0, bytes_accessed=bytes_accessed),
    )(*flat_args)

    # Only the cheap feature slice remains (no-op when dout is already lane-aligned).
    return out[:, :dout] if dout != dout_p else out
    # TODO(synk): add an N-tiled path (stream weight column-tiles via
    # pltpu.emit_pipeline, no accumulator needed) for hidden widths whose
    # resident weights exceed the per-TC VMEM budget (hit at ~half the width on v7x).


def _reference_forward(x, params):
    n = len(params)
    for i, (w, b) in enumerate(params):
        x = x @ w.T + b
        if i != n - 1:
            x = jnp.maximum(x, 0.0)
    return x


if __name__ == "__main__":
    key = jax.random.PRNGKey(0)

    # Small MLP consistent with the module: 16 -> 32 -> 32 -> 8, batch = 2.
    batch, d_in, d_hidden, d_out = 2, 16, 32, 8
    dims = [(d_hidden, d_in), (d_hidden, d_hidden), (d_out, d_hidden)]

    params = []
    for (dout, din) in dims:
        key, kw, kb = jax.random.split(key, 3)
        w = jax.random.normal(kw, (dout, din), dtype=jnp.float32) * 0.1
        b = jax.random.normal(kb, (dout,), dtype=jnp.float32) * 0.1
        params.append((w, b))

    key, kx = jax.random.split(key)
    x = jax.random.normal(kx, (batch, d_in), dtype=jnp.float32)

    prepped = prepare_params(params)          # one-time: transpose + pad + bf16 cast
    out = fixed_para_mlp_forward(x, prepped)  # single fused pallas_call
    out = jax.block_until_ready(out)

    ref = _reference_forward(x, params)
    assert out.shape == (batch, d_out)
    # bf16 matmuls with f32 accumulation vs f32 reference: bf16-appropriate tolerances.
    assert jnp.allclose(out, ref, atol=3e-2, rtol=3e-2), "mismatch vs reference"

    print("KERNEL_OK")
</pallas_src>

<mosaic_0001>
module attributes {stable_mosaic.version = 11 : i64} {
  func.func @_fused_mlp_kernel(%arg0: i32, %arg1: memref<8x16xbf16, #tpu.memory_space<vmem>>, %arg2: memref<16x128xbf16, #tpu.memory_space<vmem>>, %arg3: memref<1x128xf32, #tpu.memory_space<vmem>>, %arg4: memref<128x128xbf16, #tpu.memory_space<vmem>>, %arg5: memref<1x128xf32, #tpu.memory_space<vmem>>, %arg6: memref<128x128xbf16, #tpu.memory_space<vmem>>, %arg7: memref<1x128xf32, #tpu.memory_space<vmem>>, %arg8: memref<8x128xf32, #tpu.memory_space<vmem>>) attributes {dimension_semantics = [#tpu.dimension_semantics<parallel>], iteration_bounds = array<i64: 1>, scalar_prefetch = 0 : i64, scratch_operands = 0 : i64, tpu.core_type = #tpu.core_type<tc>, window_params = [{transform_indices = @transform_0, window_bounds = array<i64: 8, 16>}, {pipeline_mode = #tpu.pipeline_mode<synchronous>, transform_indices = @transform_1, window_bounds = array<i64: 16, 128>}, {pipeline_mode = #tpu.pipeline_mode<synchronous>, transform_indices = @transform_2, window_bounds = array<i64: 1, 128>}, {pipeline_mode = #tpu.pipeline_mode<synchronous>, transform_indices = @transform_3, window_bounds = array<i64: 128, 128>}, {pipeline_mode = #tpu.pipeline_mode<synchronous>, transform_indices = @transform_4, window_bounds = array<i64: 1, 128>}, {pipeline_mode = #tpu.pipeline_mode<synchronous>, transform_indices = @transform_5, window_bounds = array<i64: 128, 128>}, {pipeline_mode = #tpu.pipeline_mode<synchronous>, transform_indices = @transform_6, window_bounds = array<i64: 1, 128>}, {transform_indices = @transform_7, window_bounds = array<i64: 8, 128>}]} {
    %c0 = arith.constant 0 : index
    %c0_0 = arith.constant 0 : index
    %0 = vector.load %arg1[%c0, %c0_0] : memref<8x16xbf16, #tpu.memory_space<vmem>>, vector<8x16xbf16>
    %c0_1 = arith.constant 0 : index
    %c0_2 = arith.constant 0 : index
    %1 = vector.load %arg2[%c0_1, %c0_2] : memref<16x128xbf16, #tpu.memory_space<vmem>>, vector<16x128xbf16>
    %cst = arith.constant dense<0.000000e+00> : vector<8x128xf32>
    %2 = tpu.matmul %0, %1, %cst {dimension_numbers = #tpu.dot_dimension_numbers<[1], [0], [0], [1], [0, 0, 1, 1], [], []>} : vector<8x16xbf16>, vector<16x128xbf16>, vector<8x128xf32> -> vector<8x128xf32>
    %c0_3 = arith.constant 0 : index
    %c0_4 = arith.constant 0 : index
    %3 = vector.load %arg3[%c0_3, %c0_4] : memref<1x128xf32, #tpu.memory_space<vmem>>, vector<1x128xf32>
    %4 = vector.broadcast %3 : vector<1x128xf32> to vector<8x128xf32>
    %5 = arith.addf %2, %4 : vector<8x128xf32>
    %cst_5 = arith.constant 0.000000e+00 : f32
    %6 = vector.broadcast %cst_5 : f32 to vector<8x128xf32>
    %7 = arith.maximumf %5, %6 : vector<8x128xf32>
    %8 = arith.truncf %7 : vector<8x128xf32> to vector<8x128xbf16>
    %c0_6 = arith.constant 0 : index
    %c0_7 = arith.constant 0 : index
    %9 = vector.load %arg4[%c0_6, %c0_7] : memref<128x128xbf16, #tpu.memory_space<vmem>>, vector<128x128xbf16>
    %cst_8 = arith.constant dense<0.000000e+00> : vector<8x128xf32>
    %10 = tpu.matmul %8, %9, %cst_8 {dimension_numbers = #tpu.dot_dimension_numbers<[1], [0], [0], [1], [0, 0, 1, 1], [], []>} : vector<8x128xbf16>, vector<128x128xbf16>, vector<8x128xf32> -> vector<8x128xf32>
    %c0_9 = arith.constant 0 : index
    %c0_10 = arith.constant 0 : index
    %11 = vector.load %arg5[%c0_9, %c0_10] : memref<1x128xf32, #tpu.memory_space<vmem>>, vector<1x128xf32>
    %12 = vector.broadcast %11 : vector<1x128xf32> to vector<8x128xf32>
    %13 = arith.addf %10, %12 : vector<8x128xf32>
    %cst_11 = arith.constant 0.000000e+00 : f32
    %14 = vector.broadcast %cst_11 : f32 to vector<8x128xf32>
    %15 = arith.maximumf %13, %14 : vector<8x128xf32>
    %16 = arith.truncf %15 : vector<8x128xf32> to vector<8x128xbf16>
    %c0_12 = arith.constant 0 : index
    %c0_13 = arith.constant 0 : index
    %17 = vector.load %arg6[%c0_12, %c0_13] : memref<128x128xbf16, #tpu.memory_space<vmem>>, vector<128x128xbf16>
    %cst_14 = arith.constant dense<0.000000e+00> : vector<8x128xf32>
    %18 = tpu.matmul %16, %17, %cst_14 {dimension_numbers = #tpu.dot_dimension_numbers<[1], [0], [0], [1], [0, 0, 1, 1], [], []>} : vector<8x128xbf16>, vector<128x128xbf16>, vector<8x128xf32> -> vector<8x128xf32>
    %c0_15 = arith.constant 0 : index
    %c0_16 = arith.constant 0 : index
    %19 = vector.load %arg7[%c0_15, %c0_16] : memref<1x128xf32, #tpu.memory_space<vmem>>, vector<1x128xf32>
    %20 = vector.broadcast %19 : vector<1x128xf32> to vector<8x128xf32>
    %21 = arith.addf %18, %20 : vector<8x128xf32>
    %c0_17 = arith.constant 0 : index
    %c0_18 = arith.constant 0 : index
    %22 = vector.load %arg8[%c0_17, %c0_18] : memref<8x128xf32, #tpu.memory_space<vmem>>, vector<8x128xf32>
    tpu.vector_store %arg8[%c0_17, %c0_18], %21 {strides = array<i32>} : memref<8x128xf32, #tpu.memory_space<vmem>>, vector<8x128xf32>,
    return
  }
  func.func @transform_0(%arg0: i32) -> (i32, i32) {
    %c0_i32 = arith.constant 0 : i32
    %c0_i32_0 = arith.constant 0 : i32
    return %arg0, %c0_i32 : i32, i32
  }
  func.func @transform_1(%arg0: i32) -> (i32, i32) {
    %c0_i32 = arith.constant 0 : i32
    %c0_i32_0 = arith.constant 0 : i32
    %c0_i32_1 = arith.constant 0 : i32
    return %c0_i32, %c0_i32_0 : i32, i32
  }
  func.func @transform_2(%arg0: i32) -> (i32, i32) {
    %c0_i32 = arith.constant 0 : i32
    %c0_i32_0 = arith.constant 0 : i32
    %c0_i32_1 = arith.constant 0 : i32
    return %c0_i32, %c0_i32_0 : i32, i32
  }
  func.func @transform_3(%arg0: i32) -> (i32, i32) {
    %c0_i32 = arith.constant 0 : i32
    %c0_i32_0 = arith.constant 0 : i32
    %c0_i32_1 = arith.constant 0 : i32
    return %c0_i32, %c0_i32_0 : i32, i32
  }
  func.func @transform_4(%arg0: i32) -> (i32, i32) {
    %c0_i32 = arith.constant 0 : i32
    %c0_i32_0 = arith.constant 0 : i32
    %c0_i32_1 = arith.constant 0 : i32
    return %c0_i32, %c0_i32_0 : i32, i32
  }
  func.func @transform_5(%arg0: i32) -> (i32, i32) {
    %c0_i32 = arith.constant 0 : i32
    %c0_i32_0 = arith.constant 0 : i32
    %c0_i32_1 = arith.constant 0 : i32
    return %c0_i32, %c0_i32_0 : i32, i32
  }
  func.func @transform_6(%arg0: i32) -> (i32, i32) {
    %c0_i32 = arith.constant 0 : i32
    %c0_i32_0 = arith.constant 0 : i32
    %c0_i32_1 = arith.constant 0 : i32
    return %c0_i32, %c0_i32_0 : i32, i32
  }
  func.func @transform_7(%arg0: i32) -> (i32, i32) {
    %c0_i32 = arith.constant 0 : i32
    %c0_i32_0 = arith.constant 0 : i32
    return %arg0, %c0_i32 : i32, i32
  }
}

</mosaic_0001>

<bundles_post_ra>
// kernel: tpu_custom_call.1
= control target key start
LH: loop header
LB: loop body
LE: loop exit
PB: predicated region body
PF: predicated region fallthrough
CT: control target
= control target key end

     0   :  { %12 = vsyncpa [#allocation3], 0  ;;  %s818_s0 = inlined_call_operand.hbm [shape: bf16[2,16], index: 0, kind: input, shape index: {}]   ;;  %s819_s1 = inlined_call_operand.hbm [shape: bf16[16,128], index: 1, kind: input, shape index: {}]   ;;  %s820_s2 = inlined_call_operand.vmem [shape: f32[1,128], index: 2, kind: input, shape index: {}]   ;;  %s821_s3 = inlined_call_operand.hbm [shape: bf16[128,128], index: 3, kind: input, shape index: {}]   ;;  %s822_s4 = inlined_call_operand.vmem [shape: f32[1,128], index: 4, kind: input, shape index: {}]   ;;  %s823_s5 = inlined_call_operand.hbm [shape: bf16[128,128], index: 5, kind: input, shape index: {}]   ;;  %s824_s6 = inlined_call_operand.vmem [shape: f32[1,128], index: 6, kind: input, shape index: {}]   ;;  %s825_s7 = inlined_call_operand.hbm [shape: f32[2,128], index: 7, kind: output, shape index: {}]  }
   0x1   :  { %13 = vsyncpa [#allocation6], 0 }
   0x2   :  { %14 = vsyncpa [#allocation9], 0 }
   0x3   :  { %15 = vsyncpa [#allocation4], 0 }
   0x4   :  { %20 = vsyncadd [#allocation3], 48  ;;  %s656_s24 = smov [#allocation5]   ;;  %s538_s28 = scalar_lea.hbm %s819_s1, 128 }
   0x5   :  { %s33_s25 = sshll.u32 %s656_s24, 4  ;;  %p539_p0 = scmp.ne.s32.totalorder %s819_s1, %s538_s28  ;;  %s34_s25 = int_to_ptr.vmem [resolvable:$true] %s33_s25 }
   0x6   :  { %p542_p1 = scmp.lt.u32.totalorder %s538_s28, %s819_s1 }
   0x8   :  { %p544_p2 = pnand %p542_p1, %p539_p0 }
   0xa   :  { %547 = shalt.err (!%p544_p2)
}
   0xb   :  { %s548_s10 = scalar_lea.vmem %s34_s25, 128  ;;  %p553_p4 = scmp.lt.s32.totalorder %s34_s25, %s34_s25 }
   0xc   :  { %p549_p3 = scmp.ne.s32.totalorder %s34_s25, %s548_s10  ;;  %p554_p5 = scmp.lt.s32.totalorder %s548_s10, %s548_s10 }
   0xe   :  { %p555_p6 = por %p554_p5, %p553_p4 }
  0x10   :  { %p556_p7 = pnand %p555_p6, %p549_p3 }
  0x12   :  { %559 = shalt.err (!%p556_p7)
}
  0x13   :  { %s657_s11 = smov 64   ;;  %s658_s12 = smov 4  }
  0x14   :  { %39 = dma.hbm_to_vmem [thread:$0]  %s819_s1, 128, %s34_s25, [#allocation6], %s657_s11, %s657_s11, %s658_s12  }
  0x15   :  { %s659_s15 = smov [#allocation2]   ;;  %s560_s19 = scalar_lea.hbm %s818_s0, 16 }
  0x16   :  { %s21_s16 = sshll.u32 %s659_s15, 4  ;;  %p561_p8 = scmp.ne.s32.totalorder %s818_s0, %s560_s19  ;;  %s22_s16 = int_to_ptr.vmem [resolvable:$true] %s21_s16 }
  0x17   :  { %p564_p9 = scmp.lt.u32.totalorder %s560_s19, %s818_s0 }
  0x19   :  { %p566_p10 = pnand %p564_p9, %p561_p8 }
  0x1b   :  { %569 = shalt.err (!%p566_p10)
}
  0x1c   :  { %s570_s24 = scalar_lea.vmem %s22_s16, 16  ;;  %s574_s1 = scalar_lea.vmem %s22_s16, 64 }
  0x1d   :  { %p571_p11 = scmp.ne.s32.totalorder %s22_s16, %s570_s24  ;;  %p575_p12 = scmp.lt.s32.totalorder %s22_s16, %s22_s16 }
  0x1e   :  { %p576_p13 = scmp.lt.s32.totalorder %s574_s1, %s570_s24 }
  0x20   :  { %p577_p0 = por %p576_p13, %p575_p12 }
  0x22   :  { %p578_p1 = pnand %p577_p0, %p571_p11 }
  0x24   :  { %581 = shalt.err (!%p578_p1)
}
  0x25   :  { %s660_s25 = smov 16   ;;  %s661_s26 = smov 1  }
  0x26   :  { %27 = dma.hbm_to_vmem [thread:$0]  %s818_s0, 16, %s22_s16, [#allocation3], %s660_s25, %s660_s25, %s661_s26  }
  0x27   :  { %s662_s29 = smov [#allocation7]   ;;  %s663_s8 = smov [#allocation8]  }
  0x28   :  { %s47_s30 = sshll.u32 %s662_s29, 4  ;;  %s61_s9 = sshll.u32 %s663_s8, 4  ;;  %s48_s30 = int_to_ptr.vmem [resolvable:$true] %s47_s30  ;;  %s737_s9 = int_to_ptr.vmem [resolvable:$true] %s61_s9 }
  0x29   :  { %s582_s14 = scalar_lea.hbm %s821_s3, 1024 }
  0x2a   :  { %p583_p2 = scmp.ne.s32.totalorder %s821_s3, %s582_s14  ;;  %p586_p3 = scmp.lt.u32.totalorder %s582_s14, %s821_s3 }
  0x2c   :  { %p588_p4 = pnand %p586_p3, %p583_p2 }
  0x2e   :  { %591 = shalt.err (!%p588_p4)
}
  0x2f   :  { %s592_s0 = scalar_lea.vmem %s48_s30, 1024  ;;  %p597_p6 = scmp.lt.s32.totalorder %s48_s30, %s48_s30 }
  0x30   :  { %p593_p5 = scmp.ne.s32.totalorder %s48_s30, %s592_s0  ;;  %p598_p7 = scmp.lt.s32.totalorder %s592_s0, %s592_s0 }
  0x32   :  { %p599_p8 = por %p598_p7, %p597_p6 }
  0x34   :  { %p600_p9 = pnand %p599_p8, %p593_p5 }
  0x36   :  { %603 = shalt.err (!%p600_p9)
}
  0x37   :  { %53 = dma.hbm_to_vmem [thread:$0]  %s821_s3, 1024, %s48_s30, [#allocation6], %s657_s11, %s657_s11, %s658_s12  }
  0x38   :  { %s604_s23 = scalar_lea.hbm %s823_s5, 1024 }
  0x39   :  { %p605_p10 = scmp.ne.s32.totalorder %s823_s5, %s604_s23  ;;  %p608_p11 = scmp.lt.u32.totalorder %s604_s23, %s823_s5 }
  0x3b   :  { %p610_p12 = pnand %p608_p11, %p605_p10 }
  0x3d   :  { %613 = shalt.err (!%p610_p12)
}
  0x3e   :  { %s614_s27 = scalar_lea.vmem %s737_s9, 1024  ;;  %p619_p0 = scmp.lt.s32.totalorder %s737_s9, %s737_s9 }
  0x3f   :  { %p615_p13 = scmp.ne.s32.totalorder %s737_s9, %s614_s27  ;;  %p620_p1 = scmp.lt.s32.totalorder %s614_s27, %s614_s27 }
  0x41   :  { %p621_p2 = por %p620_p1, %p619_p0 }
  0x43   :  { %p622_p3 = pnand %p621_p2, %p615_p13 }
  0x45   :  { %625 = shalt.err (!%p622_p3)
}
  0x46   :  { %67 = dma.hbm_to_vmem [thread:$0]  %s823_s5, 1024, %s737_s9, [#allocation9], %s657_s11, %s657_s11, %s658_s12  }
  0x47   :  { %648 = dma.done.wait [#allocation3], 64  }
  0x48   :  { %649 = vsyncadd [#allocation3], 4294967232 }
  0x49   :  { %650 = dma.done.wait [#allocation6], 1152  }
  0x4a   :  { %651 = vsyncadd [#allocation6], 4294966144 }
  0x4b   :  { %652 = dma.done.wait [#allocation9], 1024  }
  0x4c   :  { %653 = vsyncadd [#allocation9], 4294966272  ;;  %v105_v0 = vlaneseq  ;;  %v664_v1 = vmov 0.0   ;;  %vm665_vm0 = vmmov 0   ;;  %v666_v2 = vmov 1966171168  }
  0x4d   :  { %461 = vmatprep.subr.bf16.mxu0 %v664_v1  ;;  %463 = vmatprep.mubr.msk.bf16.mxu0 %vm665_vm0, %v664_v1  ;;  %v103_v3 = vunpack.c.l.s4 %v666_v2  ;;  %v521_v6 = vld [vmem:[#allocation5] sm:$0xff]   ;;  %v83_v8 = vld [vmem:[#allocation2] sm:$0x1]  ;;  %v84_v9 = vld [vmem:[#allocation2 + $0x1] sm:$0x1]  ;;  %vm130_vm1 = vcmask 130048  }
  0x4e   :  { %467 = vmatprep.subr.bf16.mxu1 %v664_v1  ;;  %483 = vmatprep.mubr.msk.bf16.mxu1 %vm665_vm0, %v664_v1  ;;  %v106_v5 = vshrl.u32 %v105_v0, 7  ;;  %v85_v10 = vld [vmem:[#allocation2 + $0x2] sm:$0x1]  ;;  %v86_v11 = vld [vmem:[#allocation2 + $0x3] sm:$0x1]  ;;  %v100_v12 = vcombine.low %v83_v8, %v84_v9  ;;  %v522_v14 = vld [vmem:[#allocation7] sm:$0xff]  }
  0x4f   :  { %v104_v4 = vunpack.c.0.s8 %v103_v3  ;;  %462 = vmatpush3.bf16.msra.mxu0 %v521_v6  ;;  %v101_v13 = vcombine.low %v85_v10, %v86_v11  ;;  %468 = vmatpush3.bf16.msra.mxu1 %v522_v14  ;;  %v523_v17 = vld [vmem:[#allocation7 + $0x8] sm:$0xff]   ;;  %v524_v19 = vld [vmem:[#allocation7 + $0x10] sm:$0xff]   ;;  %v525_v21 = vld [vmem:[#allocation7 + $0x18] sm:$0xff]  }
  0x50   :  { %487 = vmatprep.subr.bf16.mxu0 %v664_v1  ;;  %469 = vmatprep.subr.bf16.mxu1 %v664_v1  ;;  %v526_v22 = vld [vmem:[#allocation7 + $0x20] sm:$0xff]   ;;  %v527_v23 = vld [vmem:[#allocation7 + $0x28] sm:$0xff]   ;;  %v528_v24 = vld [vmem:[#allocation7 + $0x30] sm:$0xff]  }
  0x51   :  { %v107_v7 = vsub.s32 %v104_v4, %v106_v5  ;;  %v529_v25 = vld [vmem:[#allocation7 + $0x38] sm:$0xff]   ;;  %v530_v26 = vld [vmem:[#allocation8] sm:$0xff]   ;;  %v531_v27 = vld [vmem:[#allocation8 + $0x8] sm:$0xff]  }
  0x52   :  { %v532_v28 = vld [vmem:[#allocation8 + $0x10] sm:$0xff]   ;;  %v533_v29 = vld [vmem:[#allocation8 + $0x18] sm:$0xff]   ;;  %v534_v30 = vld [vmem:[#allocation8 + $0x20] sm:$0xff]  }
  0x53   :  { %v108_v15 = vrot.slane %v100_v12, %v107_v7  ;;  %v115_v16 = vrot.slane %v101_v13, %v107_v7  ;;  %470 = vmatpush3.bf16.msra.mxu1 %v523_v17  ;;  %v535_v31 = vld [vmem:[#allocation8 + $0x28] sm:$0xff]   ;;  %v420_v32 = vld [vmem:[%s820_s2] ss:$0 sm:$0xff]  ;;  %v537_v41 = vld [vmem:[#allocation8 + $0x38] sm:$0xff]  }
  0x54   :  { %471 = vmatprep.subr.bf16.mxu1 %v664_v1  ;;  %v536_v40 = vld [vmem:[#allocation8 + $0x30] sm:$0xff]  }
  0x55   :  { %v116_v18 = vcombine.low %v108_v15, %v115_v16  ;;  %v423_v42 = vld [vmem:[%s822_s4] ss:$0 sm:$0xff] }
  0x56   :  { %v432_v50 = vld [vmem:[%s824_s6] ss:$0 sm:$0xff] }
  0x57   :  { %v123_v20 = vrot.slane %v116_v18, %v107_v7  ;;  %472 = vmatpush3.bf16.msra.mxu1 %v524_v19 }
  0x58   :  { %473 = vmatprep.subr.bf16.mxu1 %v664_v1 }
  0x59   :  { %464 = vmatmul.mubr.msk.bf16.vlgmr.msra.gmra.mrb[0].mxu0 %vm130_vm1, %v123_v20 }
  0x5a   :  { %503 = vmatprep.mubr.msk.bf16.mxu0 %vm665_vm0, %v664_v1  ;;  %488 = vmatpush3.bf16.msra.mxu0 %v530_v26 }
  0x5b   :  { %474 = vmatpush3.bf16.msra.mxu1 %v525_v21  ;;  %489 = vmatprep.subr.bf16.mxu0 %v664_v1 }
  0x5c   :  { %475 = vmatprep.subr.bf16.mxu1 %v664_v1 }
  0x5e   :  { %490 = vmatpush3.bf16.msra.mxu0 %v531_v27 }
  0x5f   :  { %476 = vmatpush3.bf16.msra.mxu1 %v526_v22  ;;  %491 = vmatprep.subr.bf16.mxu0 %v664_v1 }
  0x60   :  { %477 = vmatprep.subr.bf16.mxu1 %v664_v1 }
  0x62   :  { %492 = vmatpush3.bf16.msra.mxu0 %v532_v28 }
  0x63   :  { %478 = vmatpush3.bf16.msra.mxu1 %v527_v23  ;;  %493 = vmatprep.subr.bf16.mxu0 %v664_v1 }
  0x64   :  { %479 = vmatprep.subr.bf16.mxu1 %v664_v1 }
  0x66   :  { %494 = vmatpush3.bf16.msra.mxu0 %v533_v29 }
  0x67   :  { %480 = vmatpush3.bf16.msra.mxu1 %v528_v24  ;;  %495 = vmatprep.subr.bf16.mxu0 %v664_v1 }
  0x68   :  { %481 = vmatprep.subr.bf16.mxu1 %v664_v1 }
  0x6a   :  { %496 = vmatpush3.bf16.msra.mxu0 %v534_v30 }
  0x6b   :  { %482 = vmatpush3.bf16.msra.mxu1 %v529_v25  ;;  %497 = vmatprep.subr.bf16.mxu0 %v664_v1 }
  0x6e   :  { %498 = vmatpush3.bf16.msra.mxu0 %v535_v31 }
  0x6f   :  { %499 = vmatprep.subr.bf16.mxu0 %v664_v1 }
  0x72   :  { %500 = vmatpush3.bf16.msra.mxu0 %v536_v40 }
  0x73   :  { %501 = vmatprep.subr.bf16.mxu0 %v664_v1 }
  0x76   :  { %502 = vmatpush3.bf16.msra.mxu0 %v537_v41 }
 0x12c   :  { %v168_v33 = vpop.f32.mrb[0].mxu0 }
 0x12d   :  { %v169_v34 = vadd.f32 %v420_v32, %v168_v33  ;;  %v465_v35 = vpop.f32.mrb[1].mxu0 }
 0x12e   :  { %v171_v36 = vpop.f32.mrb[2].mxu0 }
 0x12f   :  { %v174_v37 = vmax.f32 %v169_v34, 0.0  ;;  %v466_v38 = vpop.f32.mrb[3].mxu0 }
 0x131   :  { %v175_v39 = vpack.c.bf16 %v174_v37, %v174_v37 }
 0x133   :  { %484 = vmatmul.mubr.bf16.vlgmr.msra.gmra.mrb[0].mxu1 %v175_v39 }
 0x206   :  { %v281_v43 = vpop.f32.mrb[0].mxu1 }
 0x207   :  { %v282_v44 = vadd.f32 %v423_v42, %v281_v43  ;;  %v485_v45 = vpop.f32.mrb[1].mxu1 }
 0x208   :  { %v284_v46 = vpop.f32.mrb[2].mxu1 }
 0x209   :  { %v287_v47 = vmax.f32 %v282_v44, 0.0  ;;  %v486_v48 = vpop.f32.mrb[3].mxu1 }
 0x20b   :  { %v288_v49 = vpack.c.bf16 %v287_v47, %v287_v47 }
 0x20d   :  { %504 = vmatmul.mubr.bf16.vlgmr.msra.gmra.mrb[4].mxu0 %v288_v49 }
 0x2e0   :  { %v394_v51 = vpop.f32.mrb[4].mxu0 }
 0x2e1   :  { %v395_v52 = vadd.f32 %v432_v50, %v394_v51  ;;  %v505_v53 = vpop.f32.mrb[5].mxu0 }
 0x2e2   :  { %v397_v54 = vpop.f32.mrb[6].mxu0 }
 0x2e3   :  { %400 = vst [vmem:[#allocation10] sm:$0xff] %v395_v52  ;;  %v506_v55 = vpop.f32.mrb[7].mxu0 }
 0x2e4   :  { %405 = vsyncadd [#allocation4], 96  ;;  %s667_s4 = smov [#allocation10]  }
 0x2e5   :  { %s406_s8 = sshll.u32 %s667_s4, 4  ;;  %s407_s8 = int_to_ptr.vmem [resolvable:$true] %s406_s8 }
 0x2e6   :  { %s626_s9 = scalar_lea.vmem %s407_s8, 32  ;;  %s630_s10 = scalar_lea.vmem %s407_s8, 128 }
 0x2e7   :  { %p627_p4 = scmp.ne.s32.totalorder %s407_s8, %s626_s9  ;;  %p631_p5 = scmp.lt.s32.totalorder %s407_s8, %s407_s8 }
 0x2e8   :  { %p632_p6 = scmp.lt.s32.totalorder %s630_s10, %s626_s9 }
 0x2ea   :  { %p633_p7 = por %p632_p6, %p631_p5 }
 0x2ec   :  { %p634_p8 = pnand %p633_p7, %p627_p4 }
 0x2ee   :  { %637 = shalt.err (!%p634_p8)
}
 0x2ef   :  { %s638_s14 = scalar_lea.hbm %s825_s7, 32 }
 0x2f0   :  { %p639_p9 = scmp.ne.s32.totalorder %s825_s7, %s638_s14  ;;  %p642_p10 = scmp.lt.u32.totalorder %s638_s14, %s825_s7 }
 0x2f2   :  { %p644_p11 = pnand %p642_p10, %p639_p9 }
 0x2f4   :  { %647 = shalt.err (!%p644_p11)
}
 0x2f5   :  { %s668_s0 = smov 32   ;;  %s669_s16 = smov 2  }
 0x2f6   :  { %412 = dma.vmem_to_hbm [thread:$0]  %s407_s8, 32, %s825_s7, [#allocation4], %s668_s0, %s668_s0, %s669_s16  }
 0x2f7   :  { %654 = dma.done.wait [#allocation4], 128  }
 0x2f8   :  { %655 = vsyncadd [#allocation4], 4294967168 }
 0x2f9   :  { %416 = vsyncpa [#allocation3], 1 }
 0x2fa   :  { %417 = vsyncpa [#allocation6], 1 }
 0x2fb   :  { %418 = vsyncpa [#allocation9], 1 }
 0x2fc   :  { %419 = vsyncpa [#allocation4], 1 }

</bundles_post_ra>
